<compile_context>
chip_gen: v5e
topology: v5e:2x2
jax: 0.10.0
libtpu: 0.0.40
codegen_flags: <defaults>
</compile_context>

<pallas_src>
import jax
import jax.numpy as jnp
from jax import lax
from jax.experimental import pallas as pl
from jax.experimental.pallas import tpu as pltpu


def spatial_attention_kernel(x_ref, tm_ref, tx_ref, o_ref):
    """One batch-block per grid step.

    x_ref  : (B, C, HWp)   input, spatial dims flattened & lane-padded
    tm_ref : (HWp, HWp)    conv-as-matrix acting on the channel-mean plane
    tx_ref : (HWp, HWp)    conv-as-matrix acting on the channel-max plane
    o_ref  : (B, C, HWp)   output
    """
    x = x_ref[...]
    xf = x.astype(jnp.float32)                     # robust if x arrives as bf16

    mean_c = jnp.mean(xf, axis=1)                  # (B, HWp)  channel mean
    max_c = jnp.max(xf, axis=1)                    # (B, HWp)  channel max

    cdt = tm_ref.dtype                             # bf16 (default) or f32
    logits = jnp.dot(mean_c.astype(cdt), tm_ref[...],
                     preferred_element_type=jnp.float32)
    logits = logits + jnp.dot(max_c.astype(cdt), tx_ref[...],
                              preferred_element_type=jnp.float32)   # (B, HWp)

    att = 1.0 / (1.0 + jnp.exp(-logits))           # exact sigmoid, exp -> EUP
    o_ref[...] = (xf * att[:, None, :]).astype(o_ref.dtype)


def _conv_matrices(w_oihw, H, W, HWp, dtype):
    """Build T_mean, T_max, each (HWp, HWp), such that for the zero-padded ("same")
    cross-correlation used by nn.Conv2d(2, 1, k, padding=k//2, bias=False):

        logits[h*W + w] = sum_{r,u} mean[r*W+u] * T_mean[r*W+u, h*W+w]
                        + sum_{r,u}  max[r*W+u] * T_max [r*W+u, h*W+w]

    Rows/cols >= H*W (lane padding) are zero.  w_oihw: (1, 2, k, k)."""
    k = w_oihw.shape[-1]
    p = k // 2
    K = w_oihw[0].astype(jnp.float32)                             # (2, k, k)

    di = jnp.arange(H)[:, None] - jnp.arange(H)[None, :] + p      # (r, h): r - h + p
    dj = jnp.arange(W)[:, None] - jnp.arange(W)[None, :] + p      # (u, w): u - w + p
    vi = (di >= 0) & (di < k)
    vj = (dj >= 0) & (dj < k)
    di = jnp.clip(di, 0, k - 1)
    dj = jnp.clip(dj, 0, k - 1)

    T = K[:, di, :]                                               # (2, r, h, kj)
    T = T[:, :, :, dj]                                            # (2, r, h, u, w)
    T = jnp.transpose(T, (0, 1, 3, 2, 4))                         # (2, r, u, h, w)
    mask = vi[:, None, :, None] & vj[None, :, None, :]            # (r, u, h, w)
    T = T * mask[None].astype(T.dtype)
    T = T.reshape(2, H * W, H * W)

    pad = HWp - H * W
    if pad:
        T = jnp.pad(T, ((0, 0), (0, pad), (0, pad)))
    T = T.astype(dtype)
    return T[0], T[1]


def _choose_batch_block(N, per_sample_bytes, t_bytes, vmem_budget_bytes):
    """Largest batch block whose double-buffered x/out blocks (+ single-buffered T)
    fit the VMEM budget, preferring >=2 grid steps so v7x's two TensorCores both get
    work.  On single-TC v5e/v6e, pass batch_block=N explicitly for one big block."""
    avail = max(vmem_budget_bytes - t_bytes, 4 * per_sample_bytes)
    cap = max(1, int(avail) // (4 * per_sample_bytes))   # 2x x-buf + 2x out-buf
    divs = [d for d in range(1, N + 1) if N % d == 0 and d <= cap] or [1]
    multi = [d for d in divs if N // d >= 2]
    return max(multi) if multi else max(divs)


def spatial_attention_forward(x_nchw, w_oihw, *, batch_block=None,
                              t_dtype=jnp.bfloat16,
                              vmem_budget_bytes=48 * 2**20):
    """SpatialAttention forward. x_nchw: (N, C, H, W); w_oihw: (1, 2, k, k)."""
    N, C, H, W = x_nchw.shape
    HW = H * W
    HWp = ((HW + 127) // 128) * 128                 # lane-dense minor dim
    pad = HWp - HW

    t_bytes = 2 * HWp * HWp * jnp.dtype(t_dtype).itemsize
    # Dense conv-as-matrix guard (O(HW^2) memory).
    # TODO(synk): switch to a banded/Toeplitz T for maps beyond this guard.
    assert t_bytes <= 24 * 2**20, (
        f"dense conv-as-matrix needs {t_bytes / 2**20:.1f} MiB; "
        "use a banded/Toeplitz formulation for feature maps this large")

    x_itemsize = jnp.dtype(x_nchw.dtype).itemsize
    per_sample_bytes = C * HWp * x_itemsize
    if batch_block is None:
        batch_block = _choose_batch_block(N, per_sample_bytes, t_bytes,
                                          vmem_budget_bytes)
    assert N % batch_block == 0, (N, batch_block)

    x_flat = x_nchw.reshape(N, C, HW)               # free view of contiguous NCHW
    if pad:
        x_flat = jnp.pad(x_flat, ((0, 0), (0, 0), (0, pad)))

    t_mean, t_max = _conv_matrices(w_oihw, H, W, HWp, t_dtype)

    # x/out blocks are double-buffered by the pipeline; T_* are single-buffered.
    vmem_need = 4 * batch_block * per_sample_bytes + t_bytes + (2 << 20)
    vmem_limit = int(min(max(vmem_need * 5 // 4, 32 * 2**20), 128 * 2**20))

    cost = pl.CostEstimate(
        flops=2 * N * 2 * HWp * HWp + 6 * N * C * HWp,
        transcendentals=N * HWp,
        bytes_accessed=2 * N * C * HWp * x_itemsize + t_bytes,
    )

    # Grid-invariant conv matrices: single-buffered (no second pipeline buffer).
    t_spec = pl.BlockSpec((HWp, HWp), lambda n: (0, 0),
                          pipeline_mode=pl.Buffered(buffer_count=1))

    out_flat = pl.pallas_call(
        spatial_attention_kernel,
        out_shape=jax.ShapeDtypeStruct((N, C, HWp), x_nchw.dtype),
        grid=(N // batch_block,),
        in_specs=[
            pl.BlockSpec((batch_block, C, HWp), lambda n: (n, 0, 0)),
            t_spec,
            t_spec,
        ],
        out_specs=pl.BlockSpec((batch_block, C, HWp), lambda n: (n, 0, 0)),
        compiler_params=pltpu.CompilerParams(
            dimension_semantics=("parallel",),
            vmem_limit_bytes=vmem_limit,
        ),
        cost_estimate=cost,
    )(x_flat, t_mean, t_max)

    if pad:
        out_flat = out_flat[:, :, :HW]
    return out_flat.reshape(N, C, H, W)


def spatial_attention_reference(x_nchw, w_oihw):
    """Pure-JAX reference matching the PyTorch module."""
    p = w_oihw.shape[-1] // 2
    pooled = jnp.concatenate(
        [jnp.mean(x_nchw, axis=1, keepdims=True),
         jnp.max(x_nchw, axis=1, keepdims=True)], axis=1)          # (N, 2, H, W)
    logits = lax.conv_general_dilated(
        pooled, w_oihw, (1, 1), ((p, p), (p, p)),
        dimension_numbers=("NCHW", "OIHW", "NCHW"))                # (N, 1, H, W)
    return x_nchw * jax.nn.sigmoid(logits)


if __name__ == "__main__":
    key = jax.random.PRNGKey(0)
    k_x, k_w = jax.random.split(key)

    # SpatialAttention(kernel_size=7) on a small NCHW input.
    N, C, H, W = 2, 4, 16, 16
    x = jax.random.normal(k_x, (N, C, H, W), dtype=jnp.float32)
    w = jax.random.normal(k_w, (1, 2, 7, 7), dtype=jnp.float32) * 0.1  # Conv2d(2,1,7,p=3,bias=False)

    ref = jax.block_until_ready(spatial_attention_reference(x, w))

    # Exact path: f32 conv matrices, tight tolerance.
    out_f32 = jax.block_until_ready(
        spatial_attention_forward(x, w, t_dtype=jnp.float32))
    assert out_f32.shape == (N, C, H, W), out_f32.shape
    assert jnp.allclose(out_f32, ref, atol=1e-4, rtol=1e-4), \
        float(jnp.max(jnp.abs(out_f32 - ref)))

    # Default path: bf16 conv matrices (f32 accumulation), bf16-level tolerance.
    out_bf16 = jax.block_until_ready(spatial_attention_forward(x, w))
    assert out_bf16.shape == (N, C, H, W), out_bf16.shape
    assert jnp.allclose(out_bf16, ref, atol=3e-2, rtol=3e-2), \
        float(jnp.max(jnp.abs(out_bf16 - ref)))

    print("KERNEL_OK")
</pallas_src>

<mosaic_0001>
module attributes {stable_mosaic.version = 11 : i64} {
  func.func @spatial_attention_kernel(%arg0: i32, %arg1: memref<1x4x256xf32, #tpu.memory_space<vmem>>, %arg2: memref<256x256xf32, #tpu.memory_space<vmem>>, %arg3: memref<256x256xf32, #tpu.memory_space<vmem>>, %arg4: memref<1x4x256xf32, #tpu.memory_space<vmem>>) attributes {dimension_semantics = [#tpu.dimension_semantics<parallel>], iteration_bounds = array<i64: 2>, scalar_prefetch = 0 : i64, scratch_operands = 0 : i64, tpu.core_type = #tpu.core_type<tc>, window_params = [{transform_indices = @transform_0, window_bounds = array<i64: 1, 4, 256>}, {pipeline_mode = #tpu.pipeline_mode<synchronous>, transform_indices = @transform_1, window_bounds = array<i64: 256, 256>}, {pipeline_mode = #tpu.pipeline_mode<synchronous>, transform_indices = @transform_2, window_bounds = array<i64: 256, 256>}, {transform_indices = @transform_3, window_bounds = array<i64: 1, 4, 256>}]} {
    %c0 = arith.constant 0 : index
    %c0_0 = arith.constant 0 : index
    %c0_1 = arith.constant 0 : index
    %0 = vector.load %arg1[%c0, %c0_0, %c0_1] : memref<1x4x256xf32, #tpu.memory_space<vmem>>, vector<1x4x256xf32>
    %cst = arith.constant dense<0.000000e+00> : vector<1x256xf32>
    %1 = vector.multi_reduction <add>, %0, %cst [1] : vector<1x4x256xf32> to vector<1x256xf32>
    %cst_2 = arith.constant 4.000000e+00 : f32
    %2 = vector.broadcast %cst_2 : f32 to vector<1x256xf32>
    %3 = arith.divf %1, %2 : vector<1x256xf32>
    %cst_3 = arith.constant dense<0xFF800000> : vector<1x256xf32>
    %4 = vector.multi_reduction <maximumf>, %0, %cst_3 [1] : vector<1x4x256xf32> to vector<1x256xf32>
    %c0_4 = arith.constant 0 : index
    %c0_5 = arith.constant 0 : index
    %5 = vector.load %arg2[%c0_4, %c0_5] : memref<256x256xf32, #tpu.memory_space<vmem>>, vector<256x256xf32>
    %cst_6 = arith.constant dense<0.000000e+00> : vector<1x256xf32>
    %6 = tpu.matmul %3, %5, %cst_6 {dimension_numbers = #tpu.dot_dimension_numbers<[1], [0], [0], [1], [0, 0, 1, 1], [], []>} : vector<1x256xf32>, vector<256x256xf32>, vector<1x256xf32> -> vector<1x256xf32>
    %c0_7 = arith.constant 0 : index
    %c0_8 = arith.constant 0 : index
    %7 = vector.load %arg3[%c0_7, %c0_8] : memref<256x256xf32, #tpu.memory_space<vmem>>, vector<256x256xf32>
    %cst_9 = arith.constant dense<0.000000e+00> : vector<1x256xf32>
    %8 = tpu.matmul %4, %7, %cst_9 {dimension_numbers = #tpu.dot_dimension_numbers<[1], [0], [0], [1], [0, 0, 1, 1], [], []>} : vector<1x256xf32>, vector<256x256xf32>, vector<1x256xf32> -> vector<1x256xf32>
    %9 = arith.addf %6, %8 : vector<1x256xf32>
    %cst_10 = arith.constant 0.000000e+00 : f32
    %10 = vector.broadcast %cst_10 : f32 to vector<1x256xf32>
    %11 = arith.subf %10, %9 : vector<1x256xf32>
    %12 = math.exp %11 : vector<1x256xf32>
    %cst_11 = arith.constant 1.000000e+00 : f32
    %13 = vector.broadcast %cst_11 : f32 to vector<1x256xf32>
    %14 = arith.addf %13, %12 : vector<1x256xf32>
    %cst_12 = arith.constant 1.000000e+00 : f32
    %15 = vector.broadcast %cst_12 : f32 to vector<1x256xf32>
    %16 = arith.divf %15, %14 : vector<1x256xf32>
    %17 = vector.shape_cast %16 : vector<1x256xf32> to vector<1x1x256xf32>
    %18 = vector.broadcast %17 : vector<1x1x256xf32> to vector<1x4x256xf32>
    %19 = arith.mulf %0, %18 : vector<1x4x256xf32>
    %c0_13 = arith.constant 0 : index
    %c0_14 = arith.constant 0 : index
    %c0_15 = arith.constant 0 : index
    %20 = vector.load %arg4[%c0_13, %c0_14, %c0_15] : memref<1x4x256xf32, #tpu.memory_space<vmem>>, vector<1x4x256xf32>
    tpu.vector_store %arg4[%c0_13, %c0_14, %c0_15], %19 {strides = array<i32>} : memref<1x4x256xf32, #tpu.memory_space<vmem>>, vector<1x4x256xf32>,
    return
  }
  func.func @transform_0(%arg0: i32) -> (i32, i32, i32) {
    %c0_i32 = arith.constant 0 : i32
    %c0_i32_0 = arith.constant 0 : i32
    %c0_i32_1 = arith.constant 0 : i32
    return %arg0, %c0_i32, %c0_i32_0 : i32, i32, i32
  }
  func.func @transform_1(%arg0: i32) -> (i32, i32) {
    %c0_i32 = arith.constant 0 : i32
    %c0_i32_0 = arith.constant 0 : i32
    %c0_i32_1 = arith.constant 0 : i32
    return %c0_i32, %c0_i32_0 : i32, i32
  }
  func.func @transform_2(%arg0: i32) -> (i32, i32) {
    %c0_i32 = arith.constant 0 : i32
    %c0_i32_0 = arith.constant 0 : i32
    %c0_i32_1 = arith.constant 0 : i32
    return %c0_i32, %c0_i32_0 : i32, i32
  }
  func.func @transform_3(%arg0: i32) -> (i32, i32, i32) {
    %c0_i32 = arith.constant 0 : i32
    %c0_i32_0 = arith.constant 0 : i32
    %c0_i32_1 = arith.constant 0 : i32
    return %arg0, %c0_i32, %c0_i32_0 : i32, i32, i32
  }
}

</mosaic_0001>

<bundles_post_ra>
// kernel: tpu_custom_call.1
= control target key start
LH: loop header
LB: loop body
LE: loop exit
PB: predicated region body
PF: predicated region fallthrough
CT: control target
= control target key end

     0   :  { %8 = vsyncpa [#allocation3], 0  ;;  %s1169_s0 = inlined_call_operand.hbm [shape: f32[2,4,256], index: 0, kind: input, shape index: {}]   ;;  %s1170_s1 = inlined_call_operand.hbm [shape: f32[256,256], index: 1, kind: input, shape index: {}]   ;;  %s1171_s2 = inlined_call_operand.hbm [shape: f32[256,256], index: 2, kind: input, shape index: {}]   ;;  %s1172_s3 = inlined_call_operand.hbm [shape: f32[2,4,256], index: 3, kind: output, shape index: {}]  }
   0x1   :  { %10 = vsyncpa [#allocation3 + $0x1], 0 }
   0x2   :  { %11 = vsyncpa [#allocation6], 0 }
   0x3   :  { %12 = vsyncpa [#allocation4], 0 }
   0x4   :  { %14 = vsyncpa [#allocation4 + $0x1], 0  ;;  %s1000_s12 = smov 0   ;;  %s1002_s13 = smov 0  }
   0x5   :  { %s1004_s14 = smov 0   ;;  %s1006_s15 = smov 0  }
   0x6 LB: > { %s130_s18 = sshll.u32 %s1170_s1, 4  ;;  %s1024_s19 = sadd.s32 4294967295, %s973_s15   ;;  %s973_s15 = sphi %s1006_s15, %s1183_s15   ;;  %s969_s14 = sphi %s1004_s14, %s1182_s14   ;;  %s965_s13 = sphi %s1002_s13, %s1181_s13   ;;  %s961_s12 = sphi %s1000_s12, %s1180_s12   ;;  %s131_s18 = int_to_ptr.hbm [resolvable:$true] %s130_s18 }
   0x7   : > { %p714_p0 = scmp.ge.s32.totalorder %s973_s15, 1  ;;  %p41_p1 = scmp.eq.s32.totalorder %s1024_s19, 0 }
   0x8   : > { %p119_p2 = scmp.lt.s32.totalorder %s973_s15, 3  ;;  %s975_s21 = smov [#allocation5]  }
   0x9   : > { %s132_s22 = sshll.u32 %s975_s21, 4  ;;  %s144_s25 = sshll.u32 %s1171_s2, 4  ;;  %s133_s22 = int_to_ptr.vmem [resolvable:$true] %s132_s22  ;;  %s145_s25 = int_to_ptr.hbm [resolvable:$true] %s144_s25 }
   0xa   : > { %p1029_p3 = pnand %p714_p0, %p119_p2  ;;  %s976_s26 = smov [#allocation7]  }
   0xb   : > { %s146_s27 = sshll.u32 %s976_s26, 4  ;;  %s977_s28 = smov 256   ;;  %s147_s27 = int_to_ptr.vmem [resolvable:$true] %s146_s27 }
   0xc   : > { %p745_p4 = pneg %p1029_p3  ;;  %s978_s29 = smov 16  }
   0xd   : > { %s713_s30 = sadd.s32 4294967294, %s973_s15   ;;  %s1043_s4 = sadd.s32 1, %s973_s15  }
   0xe   : > { %p746_p6 = pnand %p745_p4, %p41_p1  ;;  %s24_s5 = ssub.s32 %s973_s15, %s1043_s4 }
   0xf   : > { %s27_s6 = sadd.s32 1, %s969_s14  ;;  %p25_p7 = scmp.eq.s32.totalorder %s24_s5, 0 }
  0x10   : > { %748 = dma.hbm_to_vmem [thread:$0]  (!%p746_p6), %s131_s18, 8192, %s133_s22, [#allocation6], %s977_s28, %s977_s28, %s978_s29  }
  0x11   : > { %751 = dma.hbm_to_vmem [thread:$0]  (!%p746_p6), %s145_s25, 8192, %s147_s27, [#allocation6], %s977_s28, %s977_s28, %s978_s29  }
  0x12   : > { %p34_p8 = scmp.ne.s32.totalorder %s969_s14, %s965_s13  ;;  %p35_p9 = scmp.eq.s32.totalorder %s973_s15, 0 }
  0x13   : > { %p40_p10 = scmp.ne.s32.totalorder %s965_s13, %s961_s12  ;;  %p106_p13 = scmp.eq.s32.totalorder %s1024_s19, 1 }
  0x14   : > { %s1054_s7 = scalar_select %p25_p7, %s969_s14, %s27_s6  }
  0x15   : > { %p1056_p11 = por %p35_p9, %p34_p8  ;;  %p1062_p12 = por %p41_p1, %p40_p10 }
  0x16   : > { %p112_p0 = scmp.eq.s32.totalorder %s713_s30, 1  ;;  %p762_p2 = scmp.lt.s32.totalorder %s973_s15, 2 }
  0x17   : > { %s160_s10 = sand.u32 1, %s969_s14   ;;  %p1069_p4 = por %p106_p13, %p34_p8 }
  0x18   : > { %p1073_p6 = por %p112_p0, %p40_p10  ;;  %s718_s17 = sshll.u32 %s160_s10, 3 }
  0x19   : > { %s731_s18 = sshll.u32 %s973_s15, 3  ;;  %s164_s24 = scalar_lea.vmem [#allocation2], %s718_s17 }
  0x1a   : > { %s169_s23 = scalar_lea.hbm %s1169_s0, %s731_s18  ;;  %s173_s25 = sshll.u32 %s164_s24, 4  ;;  %s174_s25 = int_to_ptr.vmem [resolvable:$true] %s173_s25 }
  0x1b   : > { %s171_s26 = sshll.u32 %s169_s23, 4  ;;  %p1083_p7 = pnand %p762_p2, %p1056_p11  ;;  %s172_s26 = int_to_ptr.hbm [resolvable:$true] %s171_s26 }
  0x1c   : > { %s161_s28 = scalar_lea.sflag [#allocation3], %s160_s10  ;;  %s873_s29 = sshra.s32 %s172_s26, 4  ;;  %s874_s29 = int_to_ptr.hbm [resolvable:$true] %s873_s29 }
  0x1d   : > { %s875_s30 = scalar_lea.hbm %s874_s29, 8  ;;  %p877_p9 = pneg %p1083_p7 }
  0x1e   : > { %p876_p8 = scmp.ne.s32.totalorder %s874_s29, %s875_s30  ;;  %s880_s17 = scalar_lea.hbm %s1169_s0, 16 }
  0x1f   : > { %p881_p11 = scmp.lt.s32.totalorder %s874_s29, %s1169_s0  ;;  %p882_p0 = scmp.lt.s32.totalorder %s880_s17, %s875_s30 }
  0x20   : > { %p878_p10 = pnand %p877_p9, %p876_p8 }
  0x21   : > { %p883_p2 = por %p882_p0, %p881_p11 }
  0x22   : > { %p879_p13 = pneg %p878_p10 }
  0x24   : > { %p884_p5 = pnand %p883_p2, %p879_p13 }
  0x26   : > { %887 = shalt.err (!%p884_p5)
}
  0x27   : > { %755 = dma.hbm_to_vmem [thread:$0]  (!%p1083_p7), %s172_s26, 128, %s174_s25, %s161_s28  }
  0x28   : > { %182 = sbr.rel (%p1029_p3) target bundleno = 298 (0x12a), region = 32  ;;  %s1100_s10 = sand.u32 (!%p1029_p3), 1, %s965_s13  }
  0x29   : > { %s722_s21 = sshll.u32 (!%p1029_p3), %s1100_s10, 3  ;;  %s185_s22 = scalar_lea.sflag (!%p1029_p3), [#allocation3], %s1100_s10 }
  0x2a   : > { %s1106_s23 = scalar_lea.vmem (!%p1029_p3), [#allocation2], %s722_s21 }
  0x2d   : > { %948 = dma.done.wait (%p1062_p12), %s185_s22, 128  }
  0x2e   : > { %950 = vsyncadd (%p1062_p12), %s185_s22, 4294967168 }
  0x2f   : > { %952 = dma.done.wait (%p41_p1), [#allocation6], 16384  }
  0x30   : > { %954 = vsyncadd (%p41_p1), [#allocation6], 4294950912  ;;  %v366_v0 = vld [vmem:[#allocation7 + $0xf0] sm:$0xff]  ;;  %v367_v1 = vld [vmem:[#allocation7 + $0xf8] sm:$0xff]  ;;  %vm229_vm0 = vcmask 1043456   ;;  %s732_s20 = sshll.u32 %s1024_s19, 3 }
  0x31   : > { %v364_v2 = vld [vmem:[#allocation7 + $0xe0] sm:$0xff]  ;;  %400 = vmatpush.msra.mxu0 %v366_v0  ;;  %440 = vmatpush.msra.mxu2 %v367_v1  ;;  %v398_v3 = vld [vmem:[#allocation7 + $0x1f0] sm:$0xff]  ;;  %v365_v4 = vld [vmem:[#allocation7 + $0xe8] sm:$0xff]  ;;  %s619_s25 = scalar_lea.hbm %s1172_s3, %s732_s20  ;;  %s221_s26 = scalar_lea.vmem [#allocation8], %s722_s21 }
  0x32   : > { %v399_v5 = vld [vmem:[#allocation7 + $0x1f8] sm:$0xff]  ;;  %420 = vmatpush.msra.mxu1 %v398_v3  ;;  %v362_v6 = vld [vmem:[#allocation7 + $0xd0] sm:$0xff]  ;;  %v396_v7 = vld [vmem:[#allocation7 + $0x1e0] sm:$0xff]  ;;  %s621_s19 = sshll.u32 %s221_s26, 4  ;;  %s623_s27 = sshll.u32 %s619_s25, 4  ;;  %s622_s19 = int_to_ptr.vmem [resolvable:$true] %s621_s19  ;;  %s624_s27 = int_to_ptr.hbm [resolvable:$true] %s623_s27 }
  0x33   : > { %460 = vmatpush.msra.mxu3 %v399_v5  ;;  %v363_v8 = vld [vmem:[#allocation7 + $0xd8] sm:$0xff]  ;;  %401 = vmatpush.msra.mxu0 %v364_v2  ;;  %v397_v9 = vld [vmem:[#allocation7 + $0x1e8] sm:$0xff]  ;;  %v394_v10 = vld [vmem:[#allocation7 + $0x1d0] sm:$0xff]  ;;  %s608_s28 = scalar_lea.sflag [#allocation4], %s1100_s10  ;;  %s917_s29 = sshra.s32 %s624_s27, 4  ;;  %s918_s29 = int_to_ptr.hbm [resolvable:$true] %s917_s29 }
  0x34   : > { %441 = vmatpush.msra.mxu2 %v365_v4  ;;  %421 = vmatpush.msra.mxu1 %v396_v7  ;;  %v360_v11 = vld [vmem:[#allocation7 + $0xc0] sm:$0xff]  ;;  %v361_v12 = vld [vmem:[#allocation7 + $0xc8] sm:$0xff]  ;;  %v395_v13 = vld [vmem:[#allocation7 + $0x1d8] sm:$0xff]  ;;  %s919_s30 = scalar_lea.hbm %s918_s29, 8  ;;  %s923_s17 = scalar_lea.hbm %s1172_s3, 16 }
  0x35   : > { %461 = vmatpush.msra.mxu3 %v397_v9  ;;  %402 = vmatpush.msra.mxu0 %v362_v6  ;;  %v392_v14 = vld [vmem:[#allocation7 + $0x1c0] sm:$0xff]  ;;  %v393_v15 = vld [vmem:[#allocation7 + $0x1c8] sm:$0xff]  ;;  %v358_v16 = vld [vmem:[#allocation7 + $0xb0] sm:$0xff]  ;;  %p920_p1 = scmp.ne.s32.totalorder %s918_s29, %s919_s30  ;;  %p924_p12 = scmp.lt.s32.totalorder %s918_s29, %s1172_s3 }
  0x36   : > { %442 = vmatpush.msra.mxu2 %v363_v8  ;;  %422 = vmatpush.msra.mxu1 %v394_v10  ;;  %v359_v17 = vld [vmem:[#allocation7 + $0xb8] sm:$0xff]  ;;  %v390_v18 = vld [vmem:[#allocation7 + $0x1b0] sm:$0xff]  ;;  %v356_v20 = vld [vmem:[#allocation7 + $0xa0] sm:$0xff]  ;;  %p925_p7 = scmp.lt.s32.totalorder %s923_s17, %s919_s30 }
  0x37   : > { %462 = vmatpush.msra.mxu3 %v395_v13  ;;  %403 = vmatpush.msra.mxu0 %v360_v11  ;;  %v391_v19 = vld [vmem:[#allocation7 + $0x1b8] sm:$0xff]  ;;  %v357_v21 = vld [vmem:[#allocation7 + $0xa8] sm:$0xff]  ;;  %v388_v22 = vld [vmem:[#allocation7 + $0x1a0] sm:$0xff]  ;;  %p921_p3 = pnand %p920_p1, %p1069_p4 }
  0x38   : > { %443 = vmatpush.msra.mxu2 %v361_v12  ;;  %423 = vmatpush.msra.mxu1 %v392_v14  ;;  %v389_v23 = vld [vmem:[#allocation7 + $0x1a8] sm:$0xff]  ;;  %v354_v24 = vld [vmem:[#allocation7 + $0x90] sm:$0xff]  ;;  %v355_v25 = vld [vmem:[#allocation7 + $0x98] sm:$0xff]  ;;  %p926_p8 = por %p925_p7, %p924_p12 }
  0x39   : > { %463 = vmatpush.msra.mxu3 %v393_v15  ;;  %404 = vmatpush.msra.mxu0 %v358_v16  ;;  %v386_v26 = vld [vmem:[#allocation7 + $0x190] sm:$0xff]  ;;  %v387_v27 = vld [vmem:[#allocation7 + $0x198] sm:$0xff]  ;;  %v352_v28 = vld [vmem:[#allocation7 + $0x80] sm:$0xff]  ;;  %p922_p5 = pneg %p921_p3 }
  0x3a   : > { %444 = vmatpush.msra.mxu2 %v359_v17  ;;  %424 = vmatpush.msra.mxu1 %v390_v18  ;;  %v353_v29 = vld [vmem:[#allocation7 + $0x88] sm:$0xff]  ;;  %v384_v30 = vld [vmem:[#allocation7 + $0x180] sm:$0xff]  ;;  %v350_v32 = vld [vmem:[#allocation7 + $0x70] sm:$0xff] }
  0x3b   : > { %464 = vmatpush.msra.mxu3 %v391_v19  ;;  %405 = vmatpush.msra.mxu0 %v356_v20  ;;  %v385_v31 = vld [vmem:[#allocation7 + $0x188] sm:$0xff]  ;;  %v351_v33 = vld [vmem:[#allocation7 + $0x78] sm:$0xff]  ;;  %v382_v34 = vld [vmem:[#allocation7 + $0x170] sm:$0xff]  ;;  %p927_p9 = pnand %p926_p8, %p922_p5 }
  0x3c   : > { %445 = vmatpush.msra.mxu2 %v357_v21  ;;  %425 = vmatpush.msra.mxu1 %v388_v22  ;;  %v383_v35 = vld [vmem:[#allocation7 + $0x178] sm:$0xff]  ;;  %v348_v36 = vld [vmem:[#allocation7 + $0x60] sm:$0xff]  ;;  %v349_v37 = vld [vmem:[#allocation7 + $0x68] sm:$0xff] }
  0x3d   : > { %465 = vmatpush.msra.mxu3 %v389_v23  ;;  %406 = vmatpush.msra.mxu0 %v354_v24  ;;  %v380_v38 = vld [vmem:[#allocation7 + $0x160] sm:$0xff]  ;;  %v381_v39 = vld [vmem:[#allocation7 + $0x168] sm:$0xff]  ;;  %v346_v40 = vld [vmem:[#allocation7 + $0x50] sm:$0xff] }
  0x3e   : > { %446 = vmatpush.msra.mxu2 %v355_v25  ;;  %426 = vmatpush.msra.mxu1 %v386_v26  ;;  %v347_v41 = vld [vmem:[#allocation7 + $0x58] sm:$0xff]  ;;  %v378_v42 = vld [vmem:[#allocation7 + $0x150] sm:$0xff]  ;;  %v344_v44 = vld [vmem:[#allocation7 + $0x40] sm:$0xff] }
  0x3f   : > { %466 = vmatpush.msra.mxu3 %v387_v27  ;;  %407 = vmatpush.msra.mxu0 %v352_v28  ;;  %v379_v43 = vld [vmem:[#allocation7 + $0x158] sm:$0xff]  ;;  %v345_v45 = vld [vmem:[#allocation7 + $0x48] sm:$0xff]  ;;  %v376_v46 = vld [vmem:[#allocation7 + $0x140] sm:$0xff]  ;;  %v979_v28 = vmov 4.0  }
  0x40   : > { %447 = vmatpush.msra.mxu2 %v353_v29  ;;  %427 = vmatpush.msra.mxu1 %v384_v30  ;;  %v377_v47 = vld [vmem:[#allocation7 + $0x148] sm:$0xff]  ;;  %v342_v48 = vld [vmem:[#allocation7 + $0x30] sm:$0xff]  ;;  %v343_v49 = vld [vmem:[#allocation7 + $0x38] sm:$0xff]  ;;  %803 = vrcp.f32 %v979_v28 }
  0x41   : > { %467 = vmatpush.msra.mxu3 %v385_v31  ;;  %408 = vmatpush.msra.mxu0 %v350_v32  ;;  %v374_v50 = vld [vmem:[#allocation7 + $0x130] sm:$0xff]  ;;  %v375_v51 = vld [vmem:[#allocation7 + $0x138] sm:$0xff]  ;;  %v340_v52 = vld [vmem:[#allocation7 + $0x20] sm:$0xff] }
  0x42   : > { %448 = vmatpush.msra.mxu2 %v351_v33  ;;  %428 = vmatpush.msra.mxu1 %v382_v34  ;;  %v341_v53 = vld [vmem:[#allocation7 + $0x28] sm:$0xff]  ;;  %v372_v54 = vld [vmem:[#allocation7 + $0x120] sm:$0xff]  ;;  %v338_v56 = vld [vmem:[#allocation7 + $0x10] sm:$0xff] }
  0x43   : > { %468 = vmatpush.msra.mxu3 %v383_v35  ;;  %409 = vmatpush.msra.mxu0 %v348_v36  ;;  %v373_v55 = vld [vmem:[#allocation7 + $0x128] sm:$0xff]  ;;  %v339_v57 = vld [vmem:[#allocation7 + $0x18] sm:$0xff]  ;;  %v370_v58 = vld [vmem:[#allocation7 + $0x110] sm:$0xff] }
  0x44   : > { %449 = vmatpush.msra.mxu2 %v349_v37  ;;  %429 = vmatpush.msra.mxu1 %v380_v38  ;;  %v371_v59 = vld [vmem:[#allocation7 + $0x118] sm:$0xff]  ;;  %v336_v60 = vld [vmem:[#allocation7] sm:$0xff]  ;;  %v337_v61 = vld [vmem:[#allocation7 + $0x8] sm:$0xff] }
  0x45   : > { %469 = vmatpush.msra.mxu3 %v381_v39  ;;  %410 = vmatpush.msra.mxu0 %v346_v40  ;;  %v302_v62 = vld [vmem:[#allocation5 + $0xf0] sm:$0xff]  ;;  %v303_v63 = vld [vmem:[#allocation5 + $0xf8] sm:$0xff]  ;;  %v368_v0 = vld [vmem:[#allocation7 + $0x100] sm:$0xff] }
  0x46   : > { %450 = vmatpush.msra.mxu2 %v347_v41  ;;  %430 = vmatpush.msra.mxu1 %v378_v42  ;;  %v369_v1 = vld [vmem:[#allocation7 + $0x108] sm:$0xff]  ;;  %v300_v2 = vld [vmem:[#allocation5 + $0xe0] sm:$0xff]  ;;  %v334_v3 = vld [vmem:[#allocation5 + $0x1f0] sm:$0xff] }
  0x47   : > { %470 = vmatpush.msra.mxu3 %v379_v43  ;;  %411 = vmatpush.msra.mxu0 %v344_v44  ;;  %v301_v4 = vld [vmem:[#allocation5 + $0xe8] sm:$0xff]  ;;  %v335_v5 = vld [vmem:[#allocation5 + $0x1f8] sm:$0xff]  ;;  %v298_v6 = vld [vmem:[#allocation5 + $0xd0] sm:$0xff]  ;;  %v1123_v44 = vpop.eup %803 }
  0x48   : > { %451 = vmatpush.msra.mxu2 %v345_v45  ;;  %431 = vmatpush.msra.mxu1 %v376_v46  ;;  %v332_v7 = vld [vmem:[#allocation5 + $0x1e0] sm:$0xff]  ;;  %v299_v8 = vld [vmem:[#allocation5 + $0xd8] sm:$0xff]  ;;  %v333_v9 = vld [vmem:[#allocation5 + $0x1e8] sm:$0xff]  ;;  %vm249_vm1 = vweird.f32 %v1123_v44 }
  0x49   : > { %471 = vmatpush.msra.mxu3 %v377_v47  ;;  %412 = vmatpush.msra.mxu0 %v342_v48  ;;  %v296_v10 = vld [vmem:[#allocation5 + $0xc0] sm:$0xff]  ;;  %v330_v11 = vld [vmem:[#allocation5 + $0x1d0] sm:$0xff]  ;;  %v297_v12 = vld [vmem:[#allocation5 + $0xc8] sm:$0xff] }
  0x4a   : > { %452 = vmatpush.msra.mxu2 %v343_v49  ;;  %432 = vmatpush.msra.mxu1 %v374_v50  ;;  %v331_v13 = vld [vmem:[#allocation5 + $0x1d8] sm:$0xff]  ;;  %v294_v15 = vld [vmem:[#allocation5 + $0xb0] sm:$0xff]  ;;  %v328_v16 = vld [vmem:[#allocation5 + $0x1c0] sm:$0xff] }
  0x4b   : > { %472 = vmatpush.msra.mxu3 %v375_v51  ;;  %413 = vmatpush.msra.mxu0 %v340_v52  ;;  %v1117_v14 = vld [vmem:[%s1106_s23] sm:$0xff]  ;;  %v329_v18 = vld [vmem:[#allocation5 + $0x1c8] sm:$0xff]  ;;  %v292_v19 = vld [vmem:[#allocation5 + $0xa0] sm:$0xff] }
  0x4c   : > { %453 = vmatpush.msra.mxu2 %v341_v53  ;;  %433 = vmatpush.msra.mxu1 %v372_v54  ;;  %224 = vst [vmem:[#allocation1] ss:$2 sm:$0xff] %v1117_v14  ;;  %v295_v17 = vld [vmem:[#allocation5 + $0xb8] sm:$0xff]  ;;  %v326_v20 = vld [vmem:[#allocation5 + $0x1b0] sm:$0xff]  ;;  %v293_v21 = vld [vmem:[#allocation5 + $0xa8] sm:$0xff] }
  0x4d   : > { %473 = vmatpush.msra.mxu3 %v373_v55  ;;  %414 = vmatpush.msra.mxu0 %v338_v56  ;;  %v327_v22 = vld [vmem:[#allocation5 + $0x1b8] sm:$0xff]  ;;  %v290_v23 = vld [vmem:[#allocation5 + $0x90] sm:$0xff]  ;;  %v324_v24 = vld [vmem:[#allocation5 + $0x1a0] sm:$0xff]  ;;  %v245_v56 = vmul.f32 4.0, %v1123_v44 }
  0x4e   : > { %454 = vmatpush.msra.mxu2 %v339_v57  ;;  %434 = vmatpush.msra.mxu1 %v370_v58  ;;  %v291_v25 = vld [vmem:[#allocation5 + $0x98] sm:$0xff]  ;;  %v325_v26 = vld [vmem:[#allocation5 + $0x1a8] sm:$0xff]  ;;  %v288_v27 = vld [vmem:[#allocation5 + $0x80] sm:$0xff] }
  0x4f   : > { %474 = vmatpush.msra.mxu3 %v371_v59  ;;  %415 = vmatpush.msra.mxu0 %v336_v60  ;;  %v322_v29 = vld [vmem:[#allocation5 + $0x190] sm:$0xff]  ;;  %v289_v30 = vld [vmem:[#allocation5 + $0x88] sm:$0xff]  ;;  %v323_v31 = vld [vmem:[#allocation5 + $0x198] sm:$0xff] }
  0x50   : > { %455 = vmatpush.msra.mxu2 %v337_v61  ;;  %435 = vmatpush.msra.mxu1 %v368_v0  ;;  %v286_v34 = vld [vmem:[#allocation5 + $0x70] sm:$0xff]  ;;  %v320_v35 = vld [vmem:[#allocation5 + $0x180] sm:$0xff]  ;;  %v287_v38 = vld [vmem:[#allocation5 + $0x78] sm:$0xff] }
  0x51   : > { %480 = vmatpush.msrb.mxu0 %v302_v62  ;;  %475 = vmatpush.msra.mxu3 %v369_v1  ;;  %v321_v39 = vld [vmem:[#allocation5 + $0x188] sm:$0xff]  ;;  %v284_v41 = vld [vmem:[#allocation5 + $0x60] sm:$0xff]  ;;  %v318_v42 = vld [vmem:[#allocation5 + $0x170] sm:$0xff] }
  0x52   : > { %520 = vmatpush.msrb.mxu2 %v303_v63  ;;  %500 = vmatpush.msrb.mxu1 %v334_v3  ;;  %v285_v45 = vld [vmem:[#allocation5 + $0x68] sm:$0xff]  ;;  %v319_v46 = vld [vmem:[#allocation5 + $0x178] sm:$0xff]  ;;  %v282_v47 = vld [vmem:[#allocation5 + $0x50] sm:$0xff] }
  0x53   : > { %481 = vmatpush.msrb.mxu0 %v300_v2  ;;  %540 = vmatpush.msrb.mxu3 %v335_v5  ;;  %v225_v32 = vld.sshfl [vmem:[#allocation1] sm:$0xff pattern:$0x75316420]  ;;  %v226_v33 = vld.sshfl [vmem:[#allocation1 + $0x8] sm:$0xff pattern:$0x75316420] }
  0x54   : > { %521 = vmatpush.msrb.mxu2 %v301_v4  ;;  %501 = vmatpush.msrb.mxu1 %v332_v7  ;;  %253 = vst [vmem:[#allocation1] ss:$2 sm:$0xff] %v1117_v14  ;;  %v230_v36 = vsel %vm229_vm0, %v225_v32, 0.0  ;;  %v237_v37 = vsel %vm229_vm0, %v226_v33, 0.0  ;;  %v316_v48 = vld [vmem:[#allocation5 + $0x160] sm:$0xff]  ;;  %v283_v49 = vld [vmem:[#allocation5 + $0x58] sm:$0xff] }
  0x55   : > { %482 = vmatpush.msrb.mxu0 %v298_v6  ;;  %541 = vmatpush.msrb.mxu3 %v333_v9  ;;  %v231_v40 = vrot.slane %v230_v36, 4  ;;  %v238_v43 = vrot.slane %v237_v37, 4  ;;  %v317_v50 = vld [vmem:[#allocation5 + $0x168] sm:$0xff]  ;;  %v280_v51 = vld [vmem:[#allocation5 + $0x40] sm:$0xff]  ;;  %v314_v53 = vld [vmem:[#allocation5 + $0x150] sm:$0xff]  ;;  %v246_v7 = vsub.f32 1.0, %v245_v56 }
  0x56   : > { %522 = vmatpush.msrb.mxu2 %v299_v8  ;;  %502 = vmatpush.msrb.mxu1 %v330_v11  ;;  %v281_v54 = vld [vmem:[#allocation5 + $0x48] sm:$0xff]  ;;  %v315_v55 = vld [vmem:[#allocation5 + $0x158] sm:$0xff]  ;;  %v278_v62 = vld [vmem:[#allocation5 + $0x30] sm:$0xff] }
  0x57   : > { %483 = vmatpush.msrb.mxu0 %v296_v10  ;;  %542 = vmatpush.msrb.mxu3 %v331_v13  ;;  %v232_v52 = vadd.f32 %v231_v40, %v230_v36  ;;  %v239_v57 = vadd.f32 %v238_v43, %v237_v37  ;;  %v312_v63 = vld [vmem:[#allocation5 + $0x140] sm:$0xff]  ;;  %v279_v2 = vld [vmem:[#allocation5 + $0x38] sm:$0xff]  ;;  %v313_v3 = vld [vmem:[#allocation5 + $0x148] sm:$0xff] }
  0x58   : > { %523 = vmatpush.msrb.mxu2 %v297_v12  ;;  %503 = vmatpush.msrb.mxu1 %v328_v16  ;;  %v276_v5 = vld [vmem:[#allocation5 + $0x20] sm:$0xff]  ;;  %v310_v6 = vld [vmem:[#allocation5 + $0x130] sm:$0xff]  ;;  %v277_v11 = vld [vmem:[#allocation5 + $0x28] sm:$0xff] }
  0x59   : > { %484 = vmatpush.msrb.mxu0 %v294_v15  ;;  %543 = vmatpush.msrb.mxu3 %v329_v18  ;;  %v233_v4 = vrot.slane %v232_v52, 2  ;;  %v240_v8 = vrot.slane %v239_v57, 2  ;;  %v311_v12 = vld [vmem:[#allocation5 + $0x138] sm:$0xff]  ;;  %v274_v13 = vld [vmem:[#allocation5 + $0x10] sm:$0xff]  ;;  %v308_v15 = vld [vmem:[#allocation5 + $0x120] sm:$0xff] }
  0x5a   : > { %524 = vmatpush.msrb.mxu2 %v295_v17  ;;  %504 = vmatpush.msrb.mxu1 %v326_v20  ;;  %v275_v18 = vld [vmem:[#allocation5 + $0x18] sm:$0xff]  ;;  %v305_v33 = vld [vmem:[#allocation5 + $0x108] sm:$0xff] }
  0x5b   : > { %485 = vmatpush.msrb.mxu0 %v292_v19  ;;  %544 = vmatpush.msrb.mxu3 %v327_v22  ;;  %v254_v58 = vld.sshfl [vmem:[#allocation1] sm:$0xff pattern:$0x75316420]  ;;  %v255_v59 = vld.sshfl [vmem:[#allocation1 + $0x8] sm:$0xff pattern:$0x75316420]  ;;  %v234_v20 = vadd.f32 %v233_v4, %v232_v52 }
  0x5c   : > { %525 = vmatpush.msrb.mxu2 %v293_v21  ;;  %505 = vmatpush.msrb.mxu1 %v324_v24  ;;  %v258_v60 = vsel %vm229_vm0, %v254_v58, -inf  ;;  %v265_v61 = vsel %vm229_vm0, %v255_v59, -inf  ;;  %v309_v19 = vld [vmem:[#allocation5 + $0x128] sm:$0xff]  ;;  %v272_v21 = vld [vmem:[#allocation5] sm:$0xff]  ;;  %v306_v22 = vld [vmem:[#allocation5 + $0x110] sm:$0xff]  ;;  %v241_v24 = vadd.f32 %v240_v8, %v239_v57 }
  0x5d   : > { %486 = vmatpush.msrb.mxu0 %v290_v23  ;;  %545 = vmatpush.msrb.mxu3 %v325_v26  ;;  %v259_v0 = vrot.slane %v258_v60, 4  ;;  %v266_v1 = vrot.slane %v265_v61, 4  ;;  %v247_v23 = vmul.f32 %v1123_v44, %v246_v7  ;;  %v307_v28 = vld [vmem:[#allocation5 + $0x118] sm:$0xff]  ;;  %v235_v32 = vrot.slane %v234_v20, 1 }
  0x5e   : > { %526 = vmatpush.msrb.mxu2 %v291_v25  ;;  %506 = vmatpush.msrb.mxu1 %v322_v29  ;;  %v304_v29 = vld [vmem:[#allocation5 + $0x100] sm:$0xff] }
  0x5f   : > { %487 = vmatpush.msrb.mxu0 %v288_v27  ;;  %546 = vmatpush.msrb.mxu3 %v323_v31  ;;  %v260_v9 = vmax.f32 %v258_v60, %v259_v0  ;;  %v267_v10 = vmax.f32 %v265_v61, %v266_v1  ;;  %v273_v27 = vld [vmem:[#allocation5 + $0x8] sm:$0xff] }
  0x60   : > { %527 = vmatpush.msrb.mxu2 %v289_v30  ;;  %507 = vmatpush.msrb.mxu1 %v320_v35  ;;  %v242_v35 = vrot.slane %v241_v24, 1 }
  0x61   : > { %488 = vmatpush.msrb.mxu0 %v286_v34  ;;  %547 = vmatpush.msrb.mxu3 %v321_v39  ;;  %v261_v16 = vrot.slane %v260_v9, 2  ;;  %v268_v17 = vrot.slane %v267_v10, 2  ;;  %v248_v34 = vadd.f32 %v1123_v44, %v247_v23 }
  0x62   : > { %528 = vmatpush.msrb.mxu2 %v287_v38  ;;  %508 = vmatpush.msrb.mxu1 %v318_v42  ;;  %v236_v38 = vadd.f32 %v235_v32, %v234_v20  ;;  %v243_v40 = vadd.f32 %v242_v35, %v241_v24 }
  0x63   : > { %489 = vmatpush.msrb.mxu0 %v284_v41  ;;  %548 = vmatpush.msrb.mxu3 %v319_v46  ;;  %v262_v25 = vmax.f32 %v260_v9, %v261_v16  ;;  %v269_v26 = vmax.f32 %v267_v10, %v268_v17  ;;  %v250_v39 = vsel %vm249_vm1, %v1123_v44, %v248_v34 }
  0x64   : > { %529 = vmatpush.msrb.mxu2 %v285_v45  ;;  %509 = vmatpush.msrb.mxu1 %v316_v48  ;;  %v251_v41 = vmul.f32 %v250_v39, %v236_v38  ;;  %v252_v42 = vmul.f32 %v250_v39, %v243_v40 }
  0x65   : > { %490 = vmatpush.msrb.mxu0 %v282_v47  ;;  %549 = vmatpush.msrb.mxu3 %v317_v50  ;;  %v263_v30 = vrot.slane %v262_v25, 1  ;;  %v270_v31 = vrot.slane %v269_v26, 1 }
  0x66   : > { %530 = vmatpush.msrb.mxu2 %v283_v49  ;;  %510 = vmatpush.msrb.mxu1 %v314_v53 }
  0x67   : > { %491 = vmatpush.msrb.mxu0 %v280_v51  ;;  %550 = vmatpush.msrb.mxu3 %v315_v55  ;;  %v264_v36 = vmax.f32 %v262_v25, %v263_v30  ;;  %v271_v37 = vmax.f32 %v269_v26, %v270_v31 }
  0x68   : > { %531 = vmatpush.msrb.mxu2 %v281_v54  ;;  %511 = vmatpush.msrb.mxu1 %v312_v63 }
  0x69   : > { %492 = vmatpush.msrb.mxu0 %v278_v62  ;;  %551 = vmatpush.msrb.mxu3 %v313_v3 }
  0x6a   : > { %532 = vmatpush.msrb.mxu2 %v279_v2  ;;  %512 = vmatpush.msrb.mxu1 %v310_v6 }
  0x6b   : > { %493 = vmatpush.msrb.mxu0 %v276_v5  ;;  %552 = vmatpush.msrb.mxu3 %v311_v12 }
  0x6c   : > { %533 = vmatpush.msrb.mxu2 %v277_v11  ;;  %513 = vmatpush.msrb.mxu1 %v308_v15 }
  0x6d   : > { %494 = vmatpush.msrb.mxu0 %v274_v13  ;;  %553 = vmatpush.msrb.mxu3 %v309_v19 }
  0x6e   : > { %534 = vmatpush.msrb.mxu2 %v275_v18  ;;  %514 = vmatpush.msrb.mxu1 %v306_v22 }
  0x6f   : > { %495 = vmatpush.msrb.mxu0 %v272_v21  ;;  %554 = vmatpush.msrb.mxu3 %v307_v28 }
  0x70   : > { %535 = vmatpush.msrb.mxu2 %v273_v27  ;;  %515 = vmatpush.msrb.mxu1 %v304_v29 }
  0x71   : > { %555 = vmatpush.msrb.mxu3 %v305_v33  ;;  %416 = vmatmul.f32.vlgmr.msra.gmra.mxu0 %v264_v36 }
  0x72   : > { %456 = vmatmul.f32.vlgmr.msra.gmra.mxu2 %v264_v36  ;;  %476 = vmatmul.f32.vlgmr.msra.gmra.mxu3 %v271_v37 }
  0x73   : > { %436 = vmatmul.f32.vlgmr.msra.gmra.mxu1 %v271_v37 }
  0x79   : > { %496 = vmatmul.f32.vlgmr.msrb.gmra.mxu0 %v251_v41 }
  0x7a   : > { %536 = vmatmul.f32.vlgmr.msrb.gmra.mxu2 %v251_v41  ;;  %556 = vmatmul.f32.vlgmr.msrb.gmra.mxu3 %v252_v42 }
  0x7b   : > { %516 = vmatmul.f32.vlgmr.msrb.gmra.mxu1 %v252_v42 }
  0xee   : > { %v417_v43 = vpop.f32.mrf.mxu0 }
  0xf0   : > { %v437_v45 = vpop.f32.mrf.mxu1 }
  0xf1   : > { %v438_v46 = vadd.f32 %v437_v45, %v417_v43 }
  0xf5   : > { %v457_v47 = vpop.f32.mrf.mxu2  ;;  %v477_v48 = vpop.f32.mrf.mxu3 }
  0xf6   : > { %v497_v49 = vpop.f32.mrf.mxu0  ;;  %v478_v53 = vadd.f32 %v477_v48, %v457_v47 }
  0xf7   : > { %v498_v50 = vadd.f32 %v497_v49, %v438_v46 }
  0xf8   : > { %v517_v51 = vpop.f32.mrf.mxu1 }
  0xf9   : > { %v518_v52 = vadd.f32 %v517_v51, %v498_v50 }
  0xfb   : > { %v560_v54 = vsub.f32 0.0, %v518_v52 }
  0xfd   : > { %v537_v55 = vpop.f32.mrf.mxu2  ;;  %v562_v44 = vmul.f32 1.442695, %v560_v54  ;;  %v557_v57 = vpop.f32.mrf.mxu3 }
  0xfe   : > { %v538_v56 = vadd.f32 %v537_v55, %v478_v53 }
  0xff   : > { %805 = vpow2.f32 %v562_v44 }
 0x100   : > { %v558_v58 = vadd.f32 %v557_v57, %v538_v56 }
 0x102   : > { %v561_v59 = vsub.f32 0.0, %v558_v58 }
 0x104   : > { %v564_v60 = vmul.f32 1.442695, %v561_v59 }
 0x105   : > { %v806_v61 = vpop.eup %805 }
 0x106   : > { %807 = vpow2.f32 %v564_v60  ;;  %v566_v62 = vadd.f32 1.0, %v806_v61 }
 0x108   : > { %809 = vrcp.f32 %v566_v62  ;;  %vm573_vm3 = vweird.f32 %v566_v62  ;;  %v579_v9 = vand.u32 2147483648, %v566_v62  ;;  %v577_v11 = vand.u32 2147483647, %v566_v62 }
 0x10a   : > { %v580_v17 = vor.u32 1.1754944e-38, %v579_v9  ;;  %vm578_vm8 = vcmp.eq.f32.partialorder %v577_v11, 8.507059e+37 }
 0x10c   : > { %v808_v63 = vpop.eup %807 }
 0x10d   : > { %v567_v0 = vadd.f32 1.0, %v808_v63 }
 0x10e   : > { %v810_v1 = vpop.eup %809 }
 0x10f   : > { %811 = vrcp.f32 %v567_v0  ;;  %v569_v2 = vmul.f32 %v810_v1, %v566_v62  ;;  %vm574_vm2 = vweird.f32 %v810_v1  ;;  %v594_v10 = vand.u32 2147483648, %v567_v0 }
 0x110   : > { %v592_v13 = vand.u32 2147483647, %v567_v0  ;;  %vm575_vm5 = vmor %vm573_vm3, %vm574_vm2  ;;  %vm588_vm6 = vweird.f32 %v567_v0 }
 0x111   : > { %v570_v3 = vsub.f32 1.0, %v569_v2  ;;  %v595_v18 = vor.u32 1.1754944e-38, %v594_v10 }
 0x112   : > { %vm593_vm9 = vcmp.eq.f32.partialorder %v592_v13, 8.507059e+37 }
 0x113   : > { %v571_v4 = vmul.f32 %v810_v1, %v570_v3 }
 0x115   : > { %v812_v5 = vpop.eup %811  ;;  %v572_v7 = vadd.f32 %v810_v1, %v571_v4 }
 0x116   : > { %v584_v6 = vmul.f32 %v812_v5, %v567_v0  ;;  %vm589_vm4 = vweird.f32 %v812_v5 }
 0x117   : > { %v576_v16 = vsel %vm575_vm5, %v810_v1, %v572_v7  ;;  %vm590_vm7 = vmor %vm588_vm6, %vm589_vm4 }
 0x118   : > { %v585_v8 = vsub.f32 1.0, %v584_v6  ;;  %v581_v20 = vsel %vm578_vm8, %v580_v17, %v576_v16 }
 0x119   : > { %v598_v23 = vperm.slane %v581_v20, 0 }
 0x11a   : > { %v586_v12 = vmul.f32 %v812_v5, %v585_v8 }
 0x11c   : > { %v587_v15 = vadd.f32 %v812_v5, %v586_v12 }
 0x11e   : > { %v591_v19 = vsel %vm590_vm7, %v812_v5, %v587_v15 }
 0x11f   : > { %v596_v21 = vsel %vm593_vm9, %v595_v18, %v591_v19 }
 0x120   : > { %v599_v22 = vperm.slane %v596_v21, 0 }
 0x122   : > { %v602_v24 = vrot.slane %v599_v22, 4 }
 0x124   : > { %v603_v25 = vsel %vm229_vm0, %v598_v23, %v602_v24 }
 0x125   : > { %v605_v26 = vmul.f32 %v603_v25, %v1117_v14 }
 0x127   : > { %606 = vst [vmem:[%s221_s26] sm:$0xff] %v605_v26 }
 0x128   : > { %930 = shalt.err (!%p927_p9)
}
 0x129   : > { %743 = dma.vmem_to_hbm [thread:$0]  (%p1069_p4), %s622_s19, 128, %s624_s27, %s608_s28  }
 0x12a PF: > { %s635_s10 = sand.u32 1, %s961_s12   ;;  %p1179_p10 = scmp.ge.s32.totalorder %s973_s15, 2 }
 0x12b   : > { %s636_s21 = scalar_lea.sflag [#allocation4], %s635_s10 }
 0x12c   : > { %p757_p13 = pnand %p1179_p10, %p1073_p6 }
 0x12e   : > { %p758_p11 = pneg %p757_p13 }
 0x130   : > { %956 = dma.done.wait (%p758_p11), %s636_s21, 128  }
 0x131   : > { %958 = vsyncadd (%p758_p11), %s636_s21, 4294967168  ;;  %p17_p0 = scmp.ge.s32.totalorder %s1043_s4, 4   ;;  %s1180_s12 = smov %s965_s13 }
 0x132   : > { %s1181_s13 = smov %s969_s14  ;;  %s1182_s14 = smov %s1054_s7 }
 0x133   : > { %s1183_s15 = smov %s1043_s4  ;;  %19 = sbr.rel (!%p17_p0) target bundleno = 6 (0x6), region = 85 }
 0x138   :  { %642 = vsyncpa [#allocation3], 1 }
 0x139   :  { %644 = vsyncpa [#allocation3 + $0x1], 1 }
 0x13a   :  { %645 = vsyncpa [#allocation6], 1 }
 0x13b   :  { %646 = vsyncpa [#allocation4], 1 }
 0x13c   :  { %648 = vsyncpa [#allocation4 + $0x1], 1 }

</bundles_post_ra>
